<compile_context>
chip_gen: v7x
topology: tpu7x:2x2x1
jax: 0.10.0
libtpu: 0.0.40
codegen_flags: <defaults>
</compile_context>

<pallas_src>
import functools

import jax
import jax.numpy as jnp
from jax.experimental import pallas as pl
from jax.experimental.pallas import tpu as pltpu

BN_EPS = 1e-5
LANE = 128
SUBLANE = 8


def _round_up(n, m):
    return ((n + m - 1) // m) * m


def _full_spec(shape):
    """Whole-array block (no grid): single VMEM-resident tile."""
    ndim = len(shape)
    return pl.BlockSpec(shape, lambda: (0,) * ndim)


# ---------------------------------------------------------------------------
# Fused kernel: (Linear -> ReLU -> BatchNorm) * num_hidden -> Linear
# ---------------------------------------------------------------------------
def _make_fused_mlp_kernel(num_hidden, feat_pads, batch_real, batch_pad):
    inv_b = 1.0 / float(batch_real)
    need_mask = batch_pad != batch_real

    def kernel(*refs):
        x_ref = refs[0]
        w_refs = refs[1:2 + num_hidden]          # num_hidden + 1 weight refs
        vec_ref = refs[2 + num_hidden]           # packed (rows_pad, maxF) f32
        o_ref = refs[3 + num_hidden]

        vec = vec_ref[...]                       # tiny; load once, slice rows
        h = x_ref[...]                           # bf16 activations in VMEM

        for i in range(num_hidden):
            fp = feat_pads[i]
            # MXU: bf16 operands, f32 accumulation.
            z = jnp.dot(h, w_refs[i][...], preferred_element_type=jnp.float32)
            b_row = vec[3 * i:3 * i + 1, :fp]
            g_row = vec[3 * i + 1:3 * i + 2, :fp]
            be_row = vec[3 * i + 2:3 * i + 3, :fp]
            z = jnp.maximum(z + b_row, 0.0)      # bias + ReLU

            # One-pass BN stats over the (real) batch axis, f32 on VPU/XLU.
            if need_mask:
                row_ids = jax.lax.broadcasted_iota(jnp.int32, z.shape, 0)
                zm = jnp.where(row_ids < batch_real, z, 0.0)
            else:
                zm = z
            s = jnp.sum(zm, axis=0, keepdims=True)
            sq = jnp.sum(zm * zm, axis=0, keepdims=True)
            mean = s * inv_b
            var = jnp.maximum(sq * inv_b - mean * mean, 0.0)
            inv_std = jax.lax.rsqrt(var + BN_EPS)
            scale = g_row * inv_std              # (1, F)
            shift = be_row - mean * scale        # (1, F)
            h = (z * scale + shift).astype(jnp.bfloat16)

        fo = feat_pads[num_hidden]
        z = jnp.dot(h, w_refs[num_hidden][...], preferred_element_type=jnp.float32)
        b_row = vec[3 * num_hidden:3 * num_hidden + 1, :fo]
        o_ref[...] = (z + b_row).astype(o_ref.dtype)

    return kernel


def _fused_mlp_pallas(x_pad, ws, vec_pack, batch_real):
    b_pad = x_pad.shape[0]
    num_hidden = len(ws) - 1
    feat_pads = tuple(int(w.shape[1]) for w in ws)
    out_pad_dim = feat_pads[-1]

    args = [x_pad, *ws, vec_pack]
    in_specs = [_full_spec(a.shape) for a in args]
    out_specs = _full_spec((b_pad, out_pad_dim))

    # Advisory cost estimate for the XLA scheduler.
    flops = 0
    transcendentals = 0
    in_bytes = sum(int(a.size) * a.dtype.itemsize for a in args)
    out_bytes = b_pad * out_pad_dim * 4
    for i, w in enumerate(ws):
        flops += 2 * b_pad * int(w.shape[0]) * int(w.shape[1])
        if i < num_hidden:
            flops += 8 * b_pad * int(w.shape[1])     # bias/relu/BN elementwise
            transcendentals += int(w.shape[1])       # rsqrt per feature

    # VMEM budget: resident args + output, x2 headroom for activations/temps,
    # clamped to [16 MiB, 64 MiB] so the same budget is valid on v7x (64 MiB).
    resident = in_bytes + out_bytes
    vmem_limit = int(min(max(2 * resident + (2 << 20), 16 << 20), 64 << 20))

    return pl.pallas_call(
        _make_fused_mlp_kernel(num_hidden, feat_pads, batch_real, b_pad),
        out_shape=jax.ShapeDtypeStruct((b_pad, out_pad_dim), jnp.float32),
        in_specs=in_specs,
        out_specs=out_specs,
        compiler_params=pltpu.CompilerParams(vmem_limit_bytes=vmem_limit),
        cost_estimate=pl.CostEstimate(
            flops=int(flops),
            transcendentals=int(transcendentals),
            bytes_accessed=int(in_bytes + out_bytes),
        ),
    )(*args)


# ---------------------------------------------------------------------------
# Parameter init (nn.Linear-style U(-1/sqrt(fan_in), 1/sqrt(fan_in));
# BN gamma=1, beta=0). Padded kernel params carry ONLY array leaves.
# ---------------------------------------------------------------------------
def init_mlp_params(key, n_inputs, n_hidden, n_classes):
    layer_sizes = [n_inputs] + list(n_hidden) + [n_classes]
    num_layers = len(layer_sizes) - 1
    num_hidden = num_layers - 1

    out_pads = [_round_up(layer_sizes[i + 1], LANE) for i in range(num_layers)]
    max_f = max(out_pads)
    rows_pad = _round_up(3 * num_hidden + 1, SUBLANE)

    ws = []
    vec = jnp.zeros((rows_pad, max_f), jnp.float32)
    ref_layers = []
    for i in range(num_layers):
        fan_in, fan_out = layer_sizes[i], layer_sizes[i + 1]
        key, kw, kb = jax.random.split(key, 3)
        bound = float(fan_in) ** -0.5
        w = jax.random.uniform(kw, (fan_in, fan_out), jnp.float32, -bound, bound)
        b = jax.random.uniform(kb, (fan_out,), jnp.float32, -bound, bound)

        in_pad = _round_up(fan_in, LANE)
        w_pad = (jnp.zeros((in_pad, out_pads[i]), jnp.float32)
                 .at[:fan_in, :fan_out].set(w).astype(jnp.bfloat16))
        ws.append(w_pad)

        if i < num_hidden:
            gamma = jnp.ones((fan_out,), jnp.float32)
            beta = jnp.zeros((fan_out,), jnp.float32)
            vec = vec.at[3 * i, :fan_out].set(b)          # bias
            vec = vec.at[3 * i + 1, :fan_out].set(gamma)  # gamma (pads stay 0)
            # beta row stays all-zero
            ref_layers.append(("hidden", w, b, gamma, beta))
        else:
            vec = vec.at[3 * i, :fan_out].set(b)          # output bias
            ref_layers.append(("output", w, b))

    params = {"ws": tuple(ws), "vec": vec}   # arrays only -> jit-friendly pytree
    return params, ref_layers


@functools.partial(jax.jit, static_argnames=("n_classes",))
def mlp_forward(x, params, n_classes):
    B, n_in = x.shape
    ws = params["ws"]
    in_pad = ws[0].shape[0]
    b_pad = _round_up(B, SUBLANE)
    # Feed the kernel bf16 input (halves input DMA bytes; MXU sees bf16 anyway).
    x_pad = (jnp.zeros((b_pad, in_pad), jnp.bfloat16)
             .at[:B, :n_in].set(x.astype(jnp.bfloat16)))
    out_pad = _fused_mlp_pallas(x_pad, ws, params["vec"], B)
    return out_pad[:B, :n_classes]


# Plain-JAX reference mirroring the kernel math (bf16 matmul operands,
# f32 accumulation and f32 BatchNorm, training-mode biased variance).
def mlp_reference(x, ref_layers):
    out = x
    for layer in ref_layers:
        if layer[0] == "hidden":
            _, w, b, gamma, beta = layer
            h = jnp.dot(out.astype(jnp.bfloat16), w.astype(jnp.bfloat16),
                        preferred_element_type=jnp.float32) + b
            h = jnp.maximum(h, 0.0)
            mean = jnp.mean(h, axis=0, keepdims=True)
            var = jnp.mean((h - mean) ** 2, axis=0, keepdims=True)
            out = gamma * (h - mean) * jax.lax.rsqrt(var + BN_EPS) + beta
        else:
            _, w, b = layer
            out = jnp.dot(out.astype(jnp.bfloat16), w.astype(jnp.bfloat16),
                          preferred_element_type=jnp.float32) + b
    return out


if __name__ == "__main__":
    batch = 8
    n_inputs = 32
    n_hidden = [64, 32]
    n_classes = 10

    key = jax.random.PRNGKey(0)
    key, kx, kp = jax.random.split(key, 3)
    x = jax.random.normal(kx, (batch, n_inputs), jnp.float32)
    params, ref_layers = init_mlp_params(kp, n_inputs, n_hidden, n_classes)

    out = jax.block_until_ready(mlp_forward(x, params, n_classes))
    ref = mlp_reference(x, ref_layers)
    assert out.shape == (batch, n_classes)
    assert jnp.allclose(out, ref, atol=1e-2, rtol=1e-2), \
        "Pallas output mismatch vs reference (batch=8)"

    # Non-multiple-of-8 batch exercises the row-masked BN stats path.
    x2 = jax.random.normal(jax.random.PRNGKey(1), (5, n_inputs), jnp.float32)
    out2 = jax.block_until_ready(mlp_forward(x2, params, n_classes))
    ref2 = mlp_reference(x2, ref_layers)
    assert out2.shape == (5, n_classes)
    assert jnp.allclose(out2, ref2, atol=1e-2, rtol=1e-2), \
        "Pallas output mismatch vs reference (batch=5, padded rows)"

    print("KERNEL_OK")
</pallas_src>

<mosaic_0001>
module attributes {stable_mosaic.version = 11 : i64} {
  func.func @kernel(%arg0: memref<8x128xbf16, #tpu.memory_space<vmem>>, %arg1: memref<128x128xbf16, #tpu.memory_space<vmem>>, %arg2: memref<128x128xbf16, #tpu.memory_space<vmem>>, %arg3: memref<128x128xbf16, #tpu.memory_space<vmem>>, %arg4: memref<8x128xf32, #tpu.memory_space<vmem>>, %arg5: memref<8x128xf32, #tpu.memory_space<vmem>>) attributes {dimension_semantics = [], scalar_prefetch = 0 : i64, scratch_operands = 0 : i64, tpu.core_type = #tpu.core_type<tc>} {
    %c0 = arith.constant 0 : index
    %c0_0 = arith.constant 0 : index
    %0 = vector.load %arg4[%c0, %c0_0] : memref<8x128xf32, #tpu.memory_space<vmem>>, vector<8x128xf32>
    %c0_1 = arith.constant 0 : index
    %c0_2 = arith.constant 0 : index
    %1 = vector.load %arg0[%c0_1, %c0_2] : memref<8x128xbf16, #tpu.memory_space<vmem>>, vector<8x128xbf16>
    %c0_3 = arith.constant 0 : index
    %c0_4 = arith.constant 0 : index
    %2 = vector.load %arg1[%c0_3, %c0_4] : memref<128x128xbf16, #tpu.memory_space<vmem>>, vector<128x128xbf16>
    %cst = arith.constant dense<0.000000e+00> : vector<8x128xf32>
    %3 = tpu.matmul %1, %2, %cst {dimension_numbers = #tpu.dot_dimension_numbers<[1], [0], [0], [1], [0, 0, 1, 1], [], []>} : vector<8x128xbf16>, vector<128x128xbf16>, vector<8x128xf32> -> vector<8x128xf32>
    %4 = vector.extract_strided_slice %0 {offsets = [0, 0], sizes = [1, 128], strides = [1, 1]} : vector<8x128xf32> to vector<1x128xf32>
    %5 = vector.extract_strided_slice %0 {offsets = [1, 0], sizes = [1, 128], strides = [1, 1]} : vector<8x128xf32> to vector<1x128xf32>
    %6 = vector.extract_strided_slice %0 {offsets = [2, 0], sizes = [1, 128], strides = [1, 1]} : vector<8x128xf32> to vector<1x128xf32>
    %7 = vector.broadcast %4 : vector<1x128xf32> to vector<8x128xf32>
    %8 = arith.addf %3, %7 : vector<8x128xf32>
    %cst_5 = arith.constant 0.000000e+00 : f32
    %9 = vector.broadcast %cst_5 : f32 to vector<8x128xf32>
    %10 = arith.maximumf %8, %9 : vector<8x128xf32>
    %cst_6 = arith.constant dense<0.000000e+00> : vector<128xf32>
    %11 = vector.multi_reduction <add>, %10, %cst_6 [0] : vector<8x128xf32> to vector<128xf32>
    %12 = vector.shape_cast %11 : vector<128xf32> to vector<1x128xf32>
    %13 = arith.mulf %10, %10 : vector<8x128xf32>
    %cst_7 = arith.constant dense<0.000000e+00> : vector<128xf32>
    %14 = vector.multi_reduction <add>, %13, %cst_7 [0] : vector<8x128xf32> to vector<128xf32>
    %15 = vector.shape_cast %14 : vector<128xf32> to vector<1x128xf32>
    %cst_8 = arith.constant 1.250000e-01 : f32
    %16 = vector.broadcast %cst_8 : f32 to vector<1x128xf32>
    %17 = arith.mulf %12, %16 : vector<1x128xf32>
    %cst_9 = arith.constant 1.250000e-01 : f32
    %18 = vector.broadcast %cst_9 : f32 to vector<1x128xf32>
    %19 = arith.mulf %15, %18 : vector<1x128xf32>
    %20 = arith.mulf %17, %17 : vector<1x128xf32>
    %21 = arith.subf %19, %20 : vector<1x128xf32>
    %cst_10 = arith.constant 0.000000e+00 : f32
    %22 = vector.broadcast %cst_10 : f32 to vector<1x128xf32>
    %23 = arith.maximumf %21, %22 : vector<1x128xf32>
    %cst_11 = arith.constant 9.99999974E-6 : f32
    %24 = vector.broadcast %cst_11 : f32 to vector<1x128xf32>
    %25 = arith.addf %23, %24 : vector<1x128xf32>
    %26 = math.rsqrt %25 : vector<1x128xf32>
    %27 = arith.mulf %5, %26 : vector<1x128xf32>
    %28 = arith.mulf %17, %27 : vector<1x128xf32>
    %29 = arith.subf %6, %28 : vector<1x128xf32>
    %30 = vector.broadcast %27 : vector<1x128xf32> to vector<8x128xf32>
    %31 = arith.mulf %10, %30 : vector<8x128xf32>
    %32 = vector.broadcast %29 : vector<1x128xf32> to vector<8x128xf32>
    %33 = arith.addf %31, %32 : vector<8x128xf32>
    %34 = arith.truncf %33 : vector<8x128xf32> to vector<8x128xbf16>
    %c0_12 = arith.constant 0 : index
    %c0_13 = arith.constant 0 : index
    %35 = vector.load %arg2[%c0_12, %c0_13] : memref<128x128xbf16, #tpu.memory_space<vmem>>, vector<128x128xbf16>
    %cst_14 = arith.constant dense<0.000000e+00> : vector<8x128xf32>
    %36 = tpu.matmul %34, %35, %cst_14 {dimension_numbers = #tpu.dot_dimension_numbers<[1], [0], [0], [1], [0, 0, 1, 1], [], []>} : vector<8x128xbf16>, vector<128x128xbf16>, vector<8x128xf32> -> vector<8x128xf32>
    %37 = vector.extract_strided_slice %0 {offsets = [3, 0], sizes = [1, 128], strides = [1, 1]} : vector<8x128xf32> to vector<1x128xf32>
    %38 = vector.extract_strided_slice %0 {offsets = [4, 0], sizes = [1, 128], strides = [1, 1]} : vector<8x128xf32> to vector<1x128xf32>
    %39 = vector.extract_strided_slice %0 {offsets = [5, 0], sizes = [1, 128], strides = [1, 1]} : vector<8x128xf32> to vector<1x128xf32>
    %40 = vector.broadcast %37 : vector<1x128xf32> to vector<8x128xf32>
    %41 = arith.addf %36, %40 : vector<8x128xf32>
    %cst_15 = arith.constant 0.000000e+00 : f32
    %42 = vector.broadcast %cst_15 : f32 to vector<8x128xf32>
    %43 = arith.maximumf %41, %42 : vector<8x128xf32>
    %cst_16 = arith.constant dense<0.000000e+00> : vector<128xf32>
    %44 = vector.multi_reduction <add>, %43, %cst_16 [0] : vector<8x128xf32> to vector<128xf32>
    %45 = vector.shape_cast %44 : vector<128xf32> to vector<1x128xf32>
    %46 = arith.mulf %43, %43 : vector<8x128xf32>
    %cst_17 = arith.constant dense<0.000000e+00> : vector<128xf32>
    %47 = vector.multi_reduction <add>, %46, %cst_17 [0] : vector<8x128xf32> to vector<128xf32>
    %48 = vector.shape_cast %47 : vector<128xf32> to vector<1x128xf32>
    %cst_18 = arith.constant 1.250000e-01 : f32
    %49 = vector.broadcast %cst_18 : f32 to vector<1x128xf32>
    %50 = arith.mulf %45, %49 : vector<1x128xf32>
    %cst_19 = arith.constant 1.250000e-01 : f32
    %51 = vector.broadcast %cst_19 : f32 to vector<1x128xf32>
    %52 = arith.mulf %48, %51 : vector<1x128xf32>
    %53 = arith.mulf %50, %50 : vector<1x128xf32>
    %54 = arith.subf %52, %53 : vector<1x128xf32>
    %cst_20 = arith.constant 0.000000e+00 : f32
    %55 = vector.broadcast %cst_20 : f32 to vector<1x128xf32>
    %56 = arith.maximumf %54, %55 : vector<1x128xf32>
    %cst_21 = arith.constant 9.99999974E-6 : f32
    %57 = vector.broadcast %cst_21 : f32 to vector<1x128xf32>
    %58 = arith.addf %56, %57 : vector<1x128xf32>
    %59 = math.rsqrt %58 : vector<1x128xf32>
    %60 = arith.mulf %38, %59 : vector<1x128xf32>
    %61 = arith.mulf %50, %60 : vector<1x128xf32>
    %62 = arith.subf %39, %61 : vector<1x128xf32>
    %63 = vector.broadcast %60 : vector<1x128xf32> to vector<8x128xf32>
    %64 = arith.mulf %43, %63 : vector<8x128xf32>
    %65 = vector.broadcast %62 : vector<1x128xf32> to vector<8x128xf32>
    %66 = arith.addf %64, %65 : vector<8x128xf32>
    %67 = arith.truncf %66 : vector<8x128xf32> to vector<8x128xbf16>
    %c0_22 = arith.constant 0 : index
    %c0_23 = arith.constant 0 : index
    %68 = vector.load %arg3[%c0_22, %c0_23] : memref<128x128xbf16, #tpu.memory_space<vmem>>, vector<128x128xbf16>
    %cst_24 = arith.constant dense<0.000000e+00> : vector<8x128xf32>
    %69 = tpu.matmul %67, %68, %cst_24 {dimension_numbers = #tpu.dot_dimension_numbers<[1], [0], [0], [1], [0, 0, 1, 1], [], []>} : vector<8x128xbf16>, vector<128x128xbf16>, vector<8x128xf32> -> vector<8x128xf32>
    %70 = vector.extract_strided_slice %0 {offsets = [6, 0], sizes = [1, 128], strides = [1, 1]} : vector<8x128xf32> to vector<1x128xf32>
    %71 = vector.broadcast %70 : vector<1x128xf32> to vector<8x128xf32>
    %72 = arith.addf %69, %71 : vector<8x128xf32>
    %c0_25 = arith.constant 0 : index
    %c0_26 = arith.constant 0 : index
    %73 = vector.load %arg5[%c0_25, %c0_26] : memref<8x128xf32, #tpu.memory_space<vmem>>, vector<8x128xf32>
    tpu.vector_store %arg5[%c0_25, %c0_26], %72 {strides = array<i32>} : memref<8x128xf32, #tpu.memory_space<vmem>>, vector<8x128xf32>,
    return
  }
}

</mosaic_0001>

<bundles_post_ra>
// kernel: mlp_forward.1
= control target key start
LH: loop header
LB: loop body
LE: loop exit
PB: predicated region body
PF: predicated region fallthrough
CT: control target
= control target key end

     0   :  { %10 = vsyncpa [#allocation3], 0  ;;  %s879_s0 = inlined_call_operand.vmem [shape: bf16[8,128], index: 0, kind: input, shape index: {}]   ;;  %s880_s1 = inlined_call_operand.hbm [shape: bf16[128,128], index: 1, kind: input, shape index: {}]   ;;  %s881_s2 = inlined_call_operand.hbm [shape: bf16[128,128], index: 2, kind: input, shape index: {}]   ;;  %s882_s3 = inlined_call_operand.hbm [shape: bf16[128,128], index: 3, kind: input, shape index: {}]   ;;  %s883_s4 = inlined_call_operand.vmem [shape: f32[8,128], index: 4, kind: input, shape index: {}]   ;;  %s884_s5 = inlined_call_operand.hbm [shape: f32[8,128], index: 5, kind: output, shape index: {}]  }
   0x1   :  { %11 = vsyncpa [#allocation6], 0 }
   0x2   :  { %12 = vsyncpa [#allocation4], 0  ;;  %s723_s18 = smov [#allocation5]   ;;  %s724_s20 = smov [#allocation2]  }
   0x3   :  { %s32_s19 = sshll.u32 %s723_s18, 4  ;;  %s20_s21 = sshll.u32 %s724_s20, 4  ;;  %s33_s19 = int_to_ptr.vmem [resolvable:$true] %s32_s19  ;;  %s761_s21 = int_to_ptr.vmem [resolvable:$true] %s20_s21 }
   0x4   :  { %s629_s24 = scalar_lea.hbm %s881_s2, 1024 }
   0x5   :  { %p630_p0 = scmp.ne.s32.totalorder %s881_s2, %s629_s24  ;;  %p633_p1 = scmp.lt.u32.totalorder %s629_s24, %s881_s2 }
   0x7   :  { %p635_p2 = pnand %p633_p1, %p630_p0 }
   0x9   :  { %638 = shalt.err (!%p635_p2)
}
   0xa   :  { %s639_s29 = scalar_lea.vmem %s33_s19, 1024  ;;  %p644_p4 = scmp.lt.s32.totalorder %s33_s19, %s33_s19 }
   0xb   :  { %p640_p3 = scmp.ne.s32.totalorder %s33_s19, %s639_s29  ;;  %p645_p5 = scmp.lt.s32.totalorder %s639_s29, %s639_s29 }
   0xd   :  { %p646_p6 = por %p645_p5, %p644_p4 }
   0xf   :  { %p647_p7 = pnand %p646_p6, %p640_p3 }
  0x11   :  { %650 = shalt.err (!%p647_p7)
}
  0x12   :  { %s725_s30 = smov 64   ;;  %s726_s6 = smov 4  }
  0x13   :  { %38 = dma.hbm_to_vmem [thread:$0]  %s881_s2, 1024, %s33_s19, [#allocation6], %s725_s30, %s725_s30, %s726_s6  }
  0x14   :  { %s651_s11 = scalar_lea.hbm %s880_s1, 1024 }
  0x15   :  { %p652_p8 = scmp.ne.s32.totalorder %s880_s1, %s651_s11  ;;  %p655_p9 = scmp.lt.u32.totalorder %s651_s11, %s880_s1 }
  0x17   :  { %p657_p10 = pnand %p655_p9, %p652_p8 }
  0x19   :  { %660 = shalt.err (!%p657_p10)
}
  0x1a   :  { %s661_s16 = scalar_lea.vmem %s761_s21, 1024  ;;  %p666_p12 = scmp.lt.s32.totalorder %s761_s21, %s761_s21 }
  0x1b   :  { %p662_p11 = scmp.ne.s32.totalorder %s761_s21, %s661_s16  ;;  %p667_p13 = scmp.lt.s32.totalorder %s661_s16, %s661_s16 }
  0x1d   :  { %p668_p0 = por %p667_p13, %p666_p12 }
  0x1f   :  { %p669_p1 = pnand %p668_p0, %p662_p11 }
  0x21   :  { %672 = shalt.err (!%p669_p1)
}
  0x22   :  { %26 = dma.hbm_to_vmem [thread:$0]  %s880_s1, 1024, %s761_s21, [#allocation3], %s725_s30, %s725_s30, %s726_s6  }
  0x23   :  { %s727_s18 = smov [#allocation7]   ;;  %s673_s23 = scalar_lea.hbm %s882_s3, 1024 }
  0x24   :  { %s44_s19 = sshll.u32 %s727_s18, 4  ;;  %p674_p2 = scmp.ne.s32.totalorder %s882_s3, %s673_s23  ;;  %s45_s19 = int_to_ptr.vmem [resolvable:$true] %s44_s19 }
  0x25   :  { %p677_p3 = scmp.lt.u32.totalorder %s673_s23, %s882_s3 }
  0x27   :  { %p679_p4 = pnand %p677_p3, %p674_p2 }
  0x29   :  { %682 = shalt.err (!%p679_p4)
}
  0x2a   :  { %s683_s28 = scalar_lea.vmem %s45_s19, 1024  ;;  %p688_p6 = scmp.lt.s32.totalorder %s45_s19, %s45_s19 }
  0x2b   :  { %p684_p5 = scmp.ne.s32.totalorder %s45_s19, %s683_s28  ;;  %p689_p7 = scmp.lt.s32.totalorder %s683_s28, %s683_s28 }
  0x2d   :  { %p690_p8 = por %p689_p7, %p688_p6 }
  0x2f   :  { %p691_p9 = pnand %p690_p8, %p684_p5 }
  0x31   :  { %694 = shalt.err (!%p691_p9)
}
  0x32   :  { %50 = dma.hbm_to_vmem [thread:$0]  %s882_s3, 1024, %s45_s19, [#allocation6], %s725_s30, %s725_s30, %s726_s6  }
  0x33   :  { %717 = dma.done.wait [#allocation3], 1024  }
  0x34   :  { %718 = vsyncadd [#allocation3], 4294966272 }
  0x35   :  { %719 = dma.done.wait [#allocation6], 2048  }
  0x36   :  { %720 = vsyncadd [#allocation6], 4294965248  ;;  %v728_v0 = vmov 0.0   ;;  %vm729_vm0 = vmmov 0   ;;  %v601_v1 = vld [vmem:[#allocation2] sm:$0xff]   ;;  %v602_v2 = vld [vmem:[#allocation2 + $0x8] sm:$0xff]   ;;  %v81_v18 = vlaneseq }
  0x37   :  { %533 = vmatprep.subr.bf16.mxu0 %v728_v0  ;;  %549 = vmatprep.mubr.msk.bf16.mxu0 %vm729_vm0, %v728_v0  ;;  %v603_v3 = vld [vmem:[#allocation2 + $0x10] sm:$0xff]   ;;  %v604_v4 = vld [vmem:[#allocation2 + $0x18] sm:$0xff]   ;;  %v605_v5 = vld [vmem:[#allocation2 + $0x20] sm:$0xff]  }
  0x38   :  { %553 = vmatprep.subr.bf16.mxu1 %v728_v0  ;;  %569 = vmatprep.mubr.msk.bf16.mxu1 %vm729_vm0, %v728_v0  ;;  %v606_v6 = vld [vmem:[#allocation2 + $0x28] sm:$0xff]   ;;  %v607_v7 = vld [vmem:[#allocation2 + $0x30] sm:$0xff]   ;;  %v608_v8 = vld [vmem:[#allocation2 + $0x38] sm:$0xff]   ;;  %v839_v19 = vshrl.u32 %v81_v18, 7 }
  0x39   :  { %534 = vmatpush3.bf16.msra.mxu0 %v601_v1  ;;  %v64_v9 = vld [vmem:[%s879_s0] sm:$0xf]  ;;  %v610_v11 = vld [vmem:[#allocation5 + $0x8] sm:$0xff]   ;;  %v611_v12 = vld [vmem:[#allocation5 + $0x10] sm:$0xff]  }
  0x3a   :  { %535 = vmatprep.subr.bf16.mxu0 %v728_v0  ;;  %v609_v10 = vld [vmem:[#allocation5] sm:$0xff]   ;;  %v612_v13 = vld [vmem:[#allocation5 + $0x18] sm:$0xff]   ;;  %v614_v15 = vld [vmem:[#allocation5 + $0x28] sm:$0xff]   ;;  %v83_v20 = vsub.s32 0, %v839_v19  ;;  %v202_v50 = vsub.s32 1, %v839_v19  ;;  %v207_v54 = vsub.s32 2, %v839_v19 }
  0x3b   :  { %554 = vmatpush3.bf16.msra.mxu1 %v609_v10  ;;  %v613_v14 = vld [vmem:[#allocation5 + $0x20] sm:$0xff]   ;;  %v615_v16 = vld [vmem:[#allocation5 + $0x30] sm:$0xff]   ;;  %v616_v17 = vld [vmem:[#allocation5 + $0x38] sm:$0xff]  }
  0x3c   :  { %555 = vmatprep.subr.bf16.mxu1 %v728_v0  ;;  %v845_v21 = vld [vmem:[%s883_s4] sm:$0xff]  ;;  %v618_v61 = vld [vmem:[#allocation7 + $0x8] sm:$0xff]   ;;  %v619_v62 = vld [vmem:[#allocation7 + $0x10] sm:$0xff]   ;;  %s730_s4 = smov [#allocation8]  }
  0x3d   :  { %536 = vmatpush3.bf16.msra.mxu0 %v602_v2  ;;  %v84_v22 = vrot.slane %v845_v21, %v83_v20  ;;  %v617_v60 = vld [vmem:[#allocation7] sm:$0xff]   ;;  %v620_v63 = vld [vmem:[#allocation7 + $0x18] sm:$0xff]   ;;  %v622_v2 = vld [vmem:[#allocation7 + $0x28] sm:$0xff]   ;;  %s472_s6 = sshll.u32 %s730_s4, 4  ;;  %s473_s6 = int_to_ptr.vmem [resolvable:$true] %s472_s6 }
  0x3e   :  { %537 = vmatprep.subr.bf16.mxu0 %v728_v0  ;;  %v621_v1 = vld [vmem:[#allocation7 + $0x20] sm:$0xff]   ;;  %s695_s7 = scalar_lea.vmem %s473_s6, 128  ;;  %p700_p11 = scmp.lt.s32.totalorder %s473_s6, %s473_s6 }
  0x3f   :  { %556 = vmatpush3.bf16.msra.mxu1 %v610_v11  ;;  %p696_p10 = scmp.ne.s32.totalorder %s473_s6, %s695_s7  ;;  %p701_p12 = scmp.lt.s32.totalorder %s695_s7, %s695_s7 }
  0x40   :  { %557 = vmatprep.subr.bf16.mxu1 %v728_v0 }
  0x41   :  { %538 = vmatpush3.bf16.msra.mxu0 %v603_v3  ;;  %v623_v3 = vld [vmem:[#allocation7 + $0x30] sm:$0xff]   ;;  %p702_p13 = por %p701_p12, %p700_p11 }
  0x42   :  { %539 = vmatprep.subr.bf16.mxu0 %v728_v0 }
  0x43   :  { %558 = vmatpush3.bf16.msra.mxu1 %v611_v12  ;;  %p703_p0 = pnand %p702_p13, %p696_p10 }
  0x44   :  { %559 = vmatprep.subr.bf16.mxu1 %v728_v0 }
  0x45   :  { %540 = vmatpush3.bf16.msra.mxu0 %v604_v4  ;;  %v624_v4 = vld [vmem:[#allocation7 + $0x38] sm:$0xff]  }
  0x46   :  { %541 = vmatprep.subr.bf16.mxu0 %v728_v0 }
  0x47   :  { %560 = vmatpush3.bf16.msra.mxu1 %v612_v13 }
  0x48   :  { %561 = vmatprep.subr.bf16.mxu1 %v728_v0 }
  0x49   :  { %542 = vmatpush3.bf16.msra.mxu0 %v605_v5  ;;  %v229_v5 = vsub.s32 3, %v839_v19 }
  0x4a   :  { %543 = vmatprep.subr.bf16.mxu0 %v728_v0 }
  0x4b   :  { %562 = vmatpush3.bf16.msra.mxu1 %v613_v14 }
  0x4c   :  { %563 = vmatprep.subr.bf16.mxu1 %v728_v0 }
  0x4d   :  { %544 = vmatpush3.bf16.msra.mxu0 %v606_v6  ;;  %v230_v6 = vrot.slane %v845_v21, %v229_v5 }
  0x4e   :  { %545 = vmatprep.subr.bf16.mxu0 %v728_v0 }
  0x4f   :  { %564 = vmatpush3.bf16.msra.mxu1 %v614_v15 }
  0x50   :  { %565 = vmatprep.subr.bf16.mxu1 %v728_v0 }
  0x51   :  { %546 = vmatpush3.bf16.msra.mxu0 %v607_v7 }
  0x52   :  { %547 = vmatprep.subr.bf16.mxu0 %v728_v0 }
  0x53   :  { %566 = vmatpush3.bf16.msra.mxu1 %v615_v16 }
  0x54   :  { %567 = vmatprep.subr.bf16.mxu1 %v728_v0 }
  0x55   :  { %548 = vmatpush3.bf16.msra.mxu0 %v608_v8 }
  0x56   :  { %573 = vmatprep.subr.bf16.mxu0 %v728_v0 }
  0x57   :  { %568 = vmatpush3.bf16.msra.mxu1 %v616_v17 }
  0x58   :  { %550 = vmatmul.mubr.bf16.vlgmr.msra.gmra.mrb[0].mxu0 %v64_v9 }
  0x59   :  { %589 = vmatprep.mubr.msk.bf16.mxu0 %vm729_vm0, %v728_v0  ;;  %574 = vmatpush3.bf16.msra.mxu0 %v617_v60 }
  0x5a   :  { %575 = vmatprep.subr.bf16.mxu0 %v728_v0 }
  0x5d   :  { %576 = vmatpush3.bf16.msra.mxu0 %v618_v61 }
  0x5e   :  { %577 = vmatprep.subr.bf16.mxu0 %v728_v0 }
  0x61   :  { %578 = vmatpush3.bf16.msra.mxu0 %v619_v62 }
  0x62   :  { %579 = vmatprep.subr.bf16.mxu0 %v728_v0 }
  0x65   :  { %580 = vmatpush3.bf16.msra.mxu0 %v620_v63 }
  0x66   :  { %581 = vmatprep.subr.bf16.mxu0 %v728_v0 }
  0x69   :  { %582 = vmatpush3.bf16.msra.mxu0 %v621_v1 }
  0x6a   :  { %583 = vmatprep.subr.bf16.mxu0 %v728_v0 }
  0x6d   :  { %584 = vmatpush3.bf16.msra.mxu0 %v622_v2 }
  0x6e   :  { %585 = vmatprep.subr.bf16.mxu0 %v728_v0 }
  0x71   :  { %586 = vmatpush3.bf16.msra.mxu0 %v623_v3 }
  0x72   :  { %587 = vmatprep.subr.bf16.mxu0 %v728_v0 }
  0x75   :  { %588 = vmatpush3.bf16.msra.mxu0 %v624_v4 }
 0x12b   :  { %v167_v23 = vpop.f32.mrb[0].mxu0 }
 0x12c   :  { %v168_v24 = vadd.f32 %v167_v23, %v84_v22  ;;  %v551_v25 = vpop.f32.mrb[1].mxu0 }
 0x12d   :  { %v170_v26 = vpop.f32.mrb[2].mxu0 }
 0x12e   :  { %v173_v27 = vmax.f32 %v168_v24, 0.0  ;;  %v552_v28 = vpop.f32.mrb[3].mxu0 }
 0x130   :  { %v174_v29 = vrot.slane %v173_v27, 4  ;;  %v180_v30 = vmul.f32 %v173_v27, %v173_v27 }
 0x132   :  { %v175_v31 = vadd.f32 %v174_v29, %v173_v27  ;;  %v181_v32 = vrot.slane %v180_v30, 4 }
 0x134   :  { %v176_v33 = vrot.slane %v175_v31, 2  ;;  %v182_v34 = vadd.f32 %v181_v32, %v180_v30 }
 0x136   :  { %v177_v35 = vadd.f32 %v176_v33, %v175_v31  ;;  %v183_v36 = vrot.slane %v182_v34, 2 }
 0x138   :  { %v178_v37 = vrot.slane %v177_v35, 1  ;;  %v184_v38 = vadd.f32 %v183_v36, %v182_v34 }
 0x13a   :  { %v179_v39 = vadd.f32 %v178_v37, %v177_v35  ;;  %v185_v40 = vrot.slane %v184_v38, 1  ;;  %v348_v35 = vsub.s32 4, %v839_v19 }
 0x13c   :  { %v186_v41 = vadd.f32 %v185_v40, %v184_v38  ;;  %v187_v42 = vmul.f32 0.125, %v179_v39  ;;  %v353_v39 = vsub.s32 5, %v839_v19 }
 0x13e   :  { %v188_v43 = vmul.f32 0.125, %v186_v41  ;;  %v189_v44 = vmul.f32 %v187_v42, %v187_v42 }
 0x140   :  { %v190_v45 = vsub.f32 %v188_v43, %v189_v44 }
 0x142   :  { %v191_v46 = vmax.f32 %v190_v45, 0.0  ;;  %v375_v45 = vsub.s32 6, %v839_v19 }
 0x144   :  { %v192_v47 = vadd.f32 1e-05, %v191_v46  ;;  %v376_v46 = vrot.slane %v845_v21, %v375_v45 }
 0x146   :  { %625 = vrsqrt.f32 %v192_v47 }
 0x150   :  { %v626_v48 = vpop.eup %625 }
 0x151   :  { %v194_v49 = vmul.f32 %v626_v48, %v845_v21 }
 0x153   :  { %v195_v51 = vmul.f32 %v194_v49, %v187_v42  ;;  %v203_v53 = vrot.slane %v194_v49, %v202_v50 }
 0x155   :  { %v197_v52 = vrot.slane %v195_v51, 7  ;;  %v204_v56 = vmul.f32 %v203_v53, %v173_v27 }
 0x157   :  { %v199_v55 = vsub.f32 %v845_v21, %v197_v52 }
 0x159   :  { %v208_v57 = vrot.slane %v199_v55, %v207_v54 }
 0x15b   :  { %v209_v58 = vadd.f32 %v208_v57, %v204_v56 }
 0x15d   :  { %v210_v59 = vpack.c.bf16 %v209_v58, %v209_v58 }
 0x15f   :  { %570 = vmatmul.mubr.bf16.vlgmr.msra.gmra.mrb[0].mxu1 %v210_v59 }
 0x232   :  { %v313_v7 = vpop.f32.mrb[0].mxu1 }
 0x233   :  { %v314_v8 = vadd.f32 %v313_v7, %v230_v6  ;;  %v571_v9 = vpop.f32.mrb[1].mxu1 }
 0x234   :  { %v316_v10 = vpop.f32.mrb[2].mxu1 }
 0x235   :  { %v319_v11 = vmax.f32 %v314_v8, 0.0  ;;  %v572_v12 = vpop.f32.mrb[3].mxu1 }
 0x237   :  { %v320_v13 = vrot.slane %v319_v11, 4  ;;  %v326_v14 = vmul.f32 %v319_v11, %v319_v11 }
 0x239   :  { %v321_v15 = vadd.f32 %v320_v13, %v319_v11  ;;  %v327_v16 = vrot.slane %v326_v14, 4 }
 0x23b   :  { %v322_v17 = vrot.slane %v321_v15, 2  ;;  %v328_v18 = vadd.f32 %v327_v16, %v326_v14 }
 0x23d   :  { %v323_v20 = vadd.f32 %v322_v17, %v321_v15  ;;  %v329_v22 = vrot.slane %v328_v18, 2 }
 0x23f   :  { %v324_v0 = vrot.slane %v323_v20, 1  ;;  %v330_v23 = vadd.f32 %v329_v22, %v328_v18 }
 0x241   :  { %v325_v24 = vadd.f32 %v324_v0, %v323_v20  ;;  %v331_v25 = vrot.slane %v330_v23, 1 }
 0x243   :  { %v332_v26 = vadd.f32 %v331_v25, %v330_v23  ;;  %v333_v27 = vmul.f32 0.125, %v325_v24 }
 0x245   :  { %v334_v28 = vmul.f32 0.125, %v332_v26  ;;  %v335_v29 = vmul.f32 %v333_v27, %v333_v27 }
 0x247   :  { %v336_v30 = vsub.f32 %v334_v28, %v335_v29 }
 0x249   :  { %v337_v31 = vmax.f32 %v336_v30, 0.0 }
 0x24b   :  { %v338_v32 = vadd.f32 1e-05, %v337_v31 }
 0x24d   :  { %627 = vrsqrt.f32 %v338_v32 }
 0x257   :  { %v628_v33 = vpop.eup %627 }
 0x258   :  { %v340_v34 = vmul.f32 %v628_v33, %v845_v21 }
 0x25a   :  { %v341_v36 = vmul.f32 %v340_v34, %v333_v27  ;;  %v349_v37 = vrot.slane %v340_v34, %v348_v35 }
 0x25c   :  { %v343_v38 = vrot.slane %v341_v36, 7  ;;  %v350_v41 = vmul.f32 %v349_v37, %v319_v11 }
 0x25e   :  { %v345_v40 = vsub.f32 %v845_v21, %v343_v38 }
 0x260   :  { %v354_v42 = vrot.slane %v345_v40, %v353_v39 }
 0x262   :  { %v355_v43 = vadd.f32 %v354_v42, %v350_v41 }
 0x264   :  { %v356_v44 = vpack.c.bf16 %v355_v43, %v355_v43 }
 0x266   :  { %590 = vmatmul.mubr.bf16.vlgmr.msra.gmra.mrb[4].mxu0 %v356_v44 }
 0x339   :  { %v459_v47 = vpop.f32.mrb[4].mxu0 }
 0x33a   :  { %v460_v48 = vadd.f32 %v459_v47, %v376_v46  ;;  %v591_v49 = vpop.f32.mrb[5].mxu0 }
 0x33b   :  { %v462_v50 = vpop.f32.mrb[6].mxu0 }
 0x33c   :  { %465 = vst [vmem:[#allocation8] sm:$0xff] %v460_v48  ;;  %v592_v51 = vpop.f32.mrb[7].mxu0 }
 0x33d   :  { %706 = shalt.err (!%p703_p0)
}
 0x33e   :  { %s707_s10 = scalar_lea.hbm %s884_s5, 128 }
 0x33f   :  { %p708_p1 = scmp.ne.s32.totalorder %s884_s5, %s707_s10  ;;  %p711_p2 = scmp.lt.u32.totalorder %s707_s10, %s884_s5 }
 0x341   :  { %p713_p3 = pnand %p711_p2, %p708_p1 }
 0x343   :  { %716 = shalt.err (!%p713_p3)
}
 0x344   :  { %475 = dma.vmem_to_hbm [thread:$0]  %s473_s6, 128, %s884_s5, [#allocation4]  }
 0x345   :  { %721 = dma.done.wait [#allocation4], 128  }
 0x346   :  { %722 = vsyncadd [#allocation4], 4294967168 }
 0x347   :  { %479 = vsyncpa [#allocation3], 1 }
 0x348   :  { %480 = vsyncpa [#allocation6], 1 }
 0x349   :  { %481 = vsyncpa [#allocation4], 1 }

</bundles_post_ra>
